<compile_context>
chip_gen: v6e
topology: v6e:2x2x1
jax: 0.10.0
libtpu: 0.0.40
codegen_flags: <defaults>
</compile_context>

<pallas_src>
import functools
import math

import jax
import jax.numpy as jnp
from jax.experimental import pallas as pl
from jax.experimental.pallas import tpu as pltpu


# ----------------------------------------------------------------------------
# Small helpers
# ----------------------------------------------------------------------------
def _round_up(a: int, b: int) -> int:
    return (a + b - 1) // b * b


def _cdiv(a: int, b: int) -> int:
    return (a + b - 1) // b


def _sublane_pack(itemsize: int) -> int:
    # Packed rows per 32-bit sublane group: f32 -> 8, bf16 -> 16, int8/fp8 -> 32.
    return max(8, 32 // max(itemsize, 1))


@functools.lru_cache(maxsize=None)
def _vmem_budget() -> tuple:
    """(tile_budget_bytes, scoped_vmem_limit_bytes), generation-aware.

    v5e/v6e have 128 MiB VMEM per TensorCore -> use big tiles; v7x has 64 MiB
    -> stay conservative.  Falls back to the conservative setting if the
    hardware query is unavailable.
    """
    vmem_bytes = None
    try:
        info = pltpu.get_tpu_info()
        vmem_bytes = getattr(info, "vmem_capacity_bytes", None)
    except Exception:
        vmem_bytes = None
    if vmem_bytes is not None and vmem_bytes >= 100 * 1024 * 1024:
        return 80 * 1024 * 1024, 112 * 1024 * 1024      # v5e / v6e
    return 32 * 1024 * 1024, 48 * 1024 * 1024           # v7x or unknown


# ----------------------------------------------------------------------------
# pe buffer (identical math to the PyTorch __init__), dense (max_len, d_model)
# ----------------------------------------------------------------------------
def make_positional_encoding_dense(d_model: int, max_len: int = 5000,
                                   dtype=jnp.float32) -> jnp.ndarray:
    """Build the pe buffer ONCE in the model dtype and reuse across calls."""
    position = jnp.arange(0, max_len, dtype=jnp.float32)[:, None]            # (max_len, 1)
    div_term = jnp.exp(
        jnp.arange(0, d_model, 2, dtype=jnp.float32) * (-math.log(10000.0) / d_model)
    )                                                                         # (ceil(D/2),)
    angles = position * div_term                                              # (max_len, ceil(D/2))
    pe = jnp.zeros((max_len, d_model), dtype=jnp.float32)
    pe = pe.at[:, 0::2].set(jnp.sin(angles)[:, : (d_model + 1) // 2])
    pe = pe.at[:, 1::2].set(jnp.cos(angles)[:, : d_model // 2])
    return pe.astype(dtype)


# ----------------------------------------------------------------------------
# Kernels
# ----------------------------------------------------------------------------
def _pe_add_kernel_3d(x_ref, pe_ref, o_ref):
    # x_ref: (ts, B, td) ; pe_ref: (ts, td) ; o_ref: (ts, B, td)
    o_ref[...] = (x_ref[...] + pe_ref[...][:, None, :]).astype(o_ref.dtype)


def _pe_add_kernel_flat(x_ref, pe_ref, o_ref, *, batch: int):
    # x_ref: (ts, B*D) ; pe_ref: (ts, D) ; o_ref: (ts, B*D)
    pe = pe_ref[...]
    if batch > 1:
        # Lane-dim replication; only used when D % 128 == 0 so this lowers to
        # plain vreg copies (no cross-lane shuffles). VPU has huge slack here.
        pe = jnp.concatenate([pe] * batch, axis=-1)
    o_ref[...] = (x_ref[...] + pe).astype(o_ref.dtype)


# ----------------------------------------------------------------------------
# Tile sizing (padded-VMEM aware)
# ----------------------------------------------------------------------------
def _flat_row_bytes(B: int, D: int, isz: int) -> int:
    # Live VMEM per sequence row, flattened (S, B*D) layout:
    #   2x double-buffered x + 2x double-buffered out + ~1x in-kernel pe
    #   broadcast intermediate, plus 2x double-buffered dense pe rows.
    # Lane dim pads to 128.
    return 5 * _round_up(B * D, 128) * isz + 2 * _round_up(D, 128) * isz


def _3d_row_bytes(B: int, td: int, isz: int, pack: int) -> int:
    # A (B, td) plane really occupies (round_up(B, pack), round_up(td, 128))
    # in VMEM -- count the padding (feedback: small B was 4x under-counted).
    plane = _round_up(B, pack) * _round_up(td, 128) * isz
    return 5 * plane + 2 * _round_up(td, 128) * isz


def _choose_seq_tile(S: int, bytes_per_row: int, pack: int, tile_budget: int) -> int:
    """Largest sequence tile (multiple of the dtype sublane pack) that fits the
    padded-VMEM budget, capped so the grid keeps >= 4 near-equal tiles when the
    sequence is long enough (>= 2 pipelined steps per v7x TensorCore)."""
    ts_cap = tile_budget // max(bytes_per_row, 1)
    ts_cap = max(pack, (ts_cap // pack) * pack)
    ts_cap = min(ts_cap, _round_up(S, pack))
    if S >= 4 * pack:
        n_tiles = max(4, _cdiv(S, ts_cap))
        ts = _round_up(_cdiv(S, n_tiles), pack)
        ts = min(ts, ts_cap)
    else:
        ts = ts_cap
    return max(int(ts), pack)


# ----------------------------------------------------------------------------
# Forward
# ----------------------------------------------------------------------------
def positional_encoding_forward(x: jnp.ndarray, pe_dense: jnp.ndarray,
                                *, donate_x: bool = False) -> jnp.ndarray:
    """x: (S, B, D), pe_dense: (max_len, D) in the model dtype -> x + pe[:S].

    donate_x=True aliases x's HBM buffer to the output.  Only set it when the
    caller truly donates x at the jax.jit boundary (donate_argnums) and never
    reads x afterwards; otherwise XLA inserts a defensive copy and the alias
    buys nothing.
    """
    S, B, D = x.shape
    max_len, d_pe = pe_dense.shape
    if d_pe != D:
        raise ValueError(f"pe d_model {d_pe} != x d_model {D}")
    if S > max_len:
        raise ValueError(f"sequence length {S} exceeds positional-encoding max_len {max_len}")
    if pe_dense.dtype != x.dtype:
        # Fallback only -- precompute pe_dense in the model dtype so no per-call
        # cast op is emitted.
        pe_dense = pe_dense.astype(x.dtype)

    isz = x.dtype.itemsize
    pack = _sublane_pack(isz)
    tile_budget, vmem_limit = _vmem_budget()

    extra_kwargs = {}
    if donate_x:
        extra_kwargs["input_output_aliases"] = {0: 0}

    # Purely memory-bound custom call: tell XLA so it schedules neighbors well.
    cost = pl.CostEstimate(
        flops=S * B * D,
        transcendentals=0,
        bytes_accessed=2 * S * B * D * isz + S * D * isz,
    )

    # Small-batch path: with B below the sublane pack a (B, D) plane wastes up
    # to pack/B of every vreg/VMEM tile and stores are sublane-masked.  Flatten
    # to a lane-dense (S, B*D) slab instead.  Restricted to B == 1 or
    # D % 128 == 0 so the in-kernel pe replication stays lane-aligned.
    use_flat = (B == 1) or (B < pack and D % 128 == 0)

    if use_flat:
        ts = _choose_seq_tile(S, _flat_row_bytes(B, D, isz), pack, tile_budget)
        grid = (_cdiv(S, ts),)
        x2d = x.reshape(S, B * D)              # contiguous trailing-dim merge: free
        out2d = pl.pallas_call(
            functools.partial(_pe_add_kernel_flat, batch=B),
            out_shape=jax.ShapeDtypeStruct((S, B * D), x.dtype),
            grid_spec=pltpu.PrefetchScalarGridSpec(
                num_scalar_prefetch=0,
                grid=grid,
                in_specs=[
                    pl.BlockSpec((ts, B * D), lambda i: (i, 0)),
                    # Dense pe rows straight out of the (max_len, D) buffer;
                    # only the first ceil(S/ts) blocks are ever touched.
                    pl.BlockSpec((ts, D), lambda i: (i, 0)),
                ],
                out_specs=pl.BlockSpec((ts, B * D), lambda i: (i, 0)),
            ),
            compiler_params=pltpu.CompilerParams(
                dimension_semantics=("parallel",),
                vmem_limit_bytes=vmem_limit,
            ),
            cost_estimate=cost,
            **extra_kwargs,
        )(x2d, pe_dense)
        return out2d.reshape(S, B, D)

    # General path: (ts, B, td) blocks, pe broadcast over batch in-kernel.
    # If even a single pack-row slab would blow the tile budget (very wide
    # B*D), split the feature dim into lane-dense 128-multiples.
    td = D
    if D % 128 == 0 and D > 128:
        while td > 128 and _3d_row_bytes(B, td, isz, pack) * pack > tile_budget:
            td = max(128, _round_up(td // 2, 128))
    # (Wide shapes with D not a multiple of 128 rely on the scoped-limit
    #  headroom instead of a feature split; a padded-D/B split could be added.)

    ts = _choose_seq_tile(S, _3d_row_bytes(B, td, isz, pack), pack, tile_budget)
    grid = (_cdiv(S, ts), _cdiv(D, td))
    return pl.pallas_call(
        _pe_add_kernel_3d,
        out_shape=jax.ShapeDtypeStruct((S, B, D), x.dtype),
        grid_spec=pltpu.PrefetchScalarGridSpec(
            num_scalar_prefetch=0,
            grid=grid,
            in_specs=[
                pl.BlockSpec((ts, B, td), lambda i, j: (i, 0, j)),
                pl.BlockSpec((ts, td), lambda i, j: (i, j)),
            ],
            out_specs=pl.BlockSpec((ts, B, td), lambda i, j: (i, 0, j)),
        ),
        compiler_params=pltpu.CompilerParams(
            dimension_semantics=("parallel", "parallel"),
            vmem_limit_bytes=vmem_limit,
        ),
        cost_estimate=cost,
        **extra_kwargs,
    )(x, pe_dense)


# ----------------------------------------------------------------------------
# Self-check
# ----------------------------------------------------------------------------
if __name__ == "__main__":
    def _check(S, B, D, max_len, dtype=jnp.float32, tol=1e-6):
        key = jax.random.PRNGKey(0)
        x = jax.random.normal(key, (S, B, D), dtype=jnp.float32).astype(dtype)
        pe_dense = make_positional_encoding_dense(D, max_len, dtype=dtype)  # built once
        out = jax.block_until_ready(positional_encoding_forward(x, pe_dense))
        ref = x + pe_dense[:S][:, None, :]     # plain-JAX reference (PyTorch semantics)
        assert out.shape == (S, B, D) and out.dtype == x.dtype
        assert jnp.allclose(out, ref, atol=tol, rtol=tol), (S, B, D, dtype)

    # Toy shape consistent with the module (3-D path, small non-128 d_model).
    _check(S=8, B=2, D=32, max_len=64)
    # Flattened small-batch paths (B < sublane pack, lane-dense D), multi-tile grid.
    _check(S=64, B=1, D=128, max_len=128)
    _check(S=64, B=4, D=128, max_len=128)
    # General 3-D path with a sublane-dense batch (B == pack for f32).
    _check(S=64, B=8, D=128, max_len=128)
    # bf16: sublane pack 16, flattened path with in-kernel pe replication.
    _check(S=32, B=2, D=128, max_len=64, dtype=jnp.bfloat16, tol=1e-2)

    print("KERNEL_OK")
</pallas_src>

<mosaic_0001>
module attributes {stable_mosaic.version = 11 : i64} {
  func.func @_pe_add_kernel_3d(%arg0: i32, %arg1: i32, %arg2: memref<8x2x32xf32, #tpu.memory_space<vmem>>, %arg3: memref<8x32xf32, #tpu.memory_space<vmem>>, %arg4: memref<8x2x32xf32, #tpu.memory_space<vmem>>) attributes {dimension_semantics = [#tpu.dimension_semantics<parallel>, #tpu.dimension_semantics<parallel>], iteration_bounds = array<i64: 1, 1>, scalar_prefetch = 0 : i64, scratch_operands = 0 : i64, tpu.core_type = #tpu.core_type<tc>, window_params = [{transform_indices = @transform_0, window_bounds = array<i64: 8, 2, 32>}, {transform_indices = @transform_1, window_bounds = array<i64: 8, 32>}, {transform_indices = @transform_2, window_bounds = array<i64: 8, 2, 32>}]} {
    %c0 = arith.constant 0 : index
    %c0_0 = arith.constant 0 : index
    %c0_1 = arith.constant 0 : index
    %0 = vector.load %arg2[%c0, %c0_0, %c0_1] : memref<8x2x32xf32, #tpu.memory_space<vmem>>, vector<8x2x32xf32>
    %c0_2 = arith.constant 0 : index
    %c0_3 = arith.constant 0 : index
    %1 = vector.load %arg3[%c0_2, %c0_3] : memref<8x32xf32, #tpu.memory_space<vmem>>, vector<8x32xf32>
    %2 = vector.shape_cast %1 : vector<8x32xf32> to vector<8x1x32xf32>
    %3 = vector.broadcast %2 : vector<8x1x32xf32> to vector<8x2x32xf32>
    %4 = arith.addf %0, %3 : vector<8x2x32xf32>
    %c0_4 = arith.constant 0 : index
    %c0_5 = arith.constant 0 : index
    %c0_6 = arith.constant 0 : index
    %5 = vector.load %arg4[%c0_4, %c0_5, %c0_6] : memref<8x2x32xf32, #tpu.memory_space<vmem>>, vector<8x2x32xf32>
    tpu.vector_store %arg4[%c0_4, %c0_5, %c0_6], %4 {strides = array<i32>} : memref<8x2x32xf32, #tpu.memory_space<vmem>>, vector<8x2x32xf32>,
    return
  }
  func.func @transform_0(%arg0: i32, %arg1: i32) -> (i32, i32, i32) {
    %c0_i32 = arith.constant 0 : i32
    %c0_i32_0 = arith.constant 0 : i32
    return %arg0, %c0_i32, %arg1 : i32, i32, i32
  }
  func.func @transform_1(%arg0: i32, %arg1: i32) -> (i32, i32) {
    %c0_i32 = arith.constant 0 : i32
    return %arg0, %arg1 : i32, i32
  }
  func.func @transform_2(%arg0: i32, %arg1: i32) -> (i32, i32, i32) {
    %c0_i32 = arith.constant 0 : i32
    %c0_i32_0 = arith.constant 0 : i32
    return %arg0, %c0_i32, %arg1 : i32, i32, i32
  }
}

</mosaic_0001>

<bundles_post_ra>
// kernel: tpu_custom_call.1
= control target key start
LH: loop header
LB: loop body
LE: loop exit
PB: predicated region body
PF: predicated region fallthrough
CT: control target
= control target key end

     0   :  { %v26_v1 = vlaneseq  ;;  %v170_v2 = vmov 1966171168   ;;  %s227_s0 = inlined_call_operand.vmem [shape: f32[8,2,32], index: 0, kind: input, shape index: {}]   ;;  %s228_s1 = inlined_call_operand.vmem [shape: f32[64,32], index: 1, kind: input, shape index: {}]   ;;  %s229_s2 = inlined_call_operand.hbm [shape: f32[8,2,32], index: 2, kind: output, shape index: {}]  }
   0x1   :  { %v20_v0 = vld [vmem:[%s228_s1] sm:$0xff]  ;;  %v24_v3 = vunpack.c.l.s4 %v170_v2 }
   0x2   :  { %v27_v4 = vshrl.u32 %v26_v1, 7  ;;  %v22_v6 = vcombine.high %v20_v0, %v20_v0 }
   0x3   :  { %v25_v5 = vunpack.c.0.s8 %v24_v3 }
   0x4   :  { %7 = vsyncpa [#allocation3], 0  ;;  %v73_v9 = vsub.s32 0, %v27_v4  ;;  %v12_v15 = vld [vmem:[%s227_s0] sm:$0x3]  ;;  %vm119_vm0 = vcmask 254976  }
   0x5   :  { %v28_v7 = vsub.s32 %v25_v5, %v27_v4  ;;  %v16_v19 = vld [vmem:[%s227_s0 + $0x8] sm:$0x3]  ;;  %v13_v21 = vld [vmem:[%s227_s0 + $0x2] sm:$0x3]  ;;  %v14_v22 = vld [vmem:[%s227_s0 + $0x4] sm:$0x3] }
   0x6   :  { %v17_v29 = vld [vmem:[%s227_s0 + $0xa] sm:$0x3]  ;;  %v18_v30 = vld [vmem:[%s227_s0 + $0xc] sm:$0x3]  ;;  %v15_v31 = vld [vmem:[%s227_s0 + $0x6] sm:$0x3] }
   0x7   :  { %v29_v8 = vrot.slane %v20_v0, %v28_v7  ;;  %v36_v10 = vrot.slane %v22_v6, %v28_v7  ;;  %v19_v39 = vld [vmem:[%s227_s0 + $0xe] sm:$0x3]  ;;  %s171_s26 = smov [#allocation2]  }
   0x8   :  { %s133_s27 = sshll.u32 %s171_s26, 4  ;;  %s134_s27 = int_to_ptr.vmem [resolvable:$true] %s133_s27 }
   0x9   :  { %v45_v11 = vrot.slane %v29_v8, %v28_v7  ;;  %v37_v12 = vcombine.high %v29_v8, %v29_v8  ;;  %v52_v13 = vrot.slane %v36_v10, %v28_v7  ;;  %v38_v14 = vcombine.high %v36_v10, %v36_v10  ;;  %s148_s0 = scalar_lea.vmem %s134_s27, 256  ;;  %p153_p1 = scmp.lt.s32.totalorder %s134_s27, %s134_s27 }
   0xa   :  { %p149_p0 = scmp.ne.s32.totalorder %s134_s27, %s148_s0  ;;  %p154_p2 = scmp.lt.s32.totalorder %s148_s0, %s148_s0 }
   0xb   :  { %v74_v16 = vrot.slane %v45_v11, %v73_v9  ;;  %v59_v17 = vrot.slane %v37_v12, %v28_v7  ;;  %v67_v18 = vcombine.high %v45_v11, %v45_v11  ;;  %v90_v20 = vrot.slane %v52_v13, %v73_v9 }
   0xc   :  { %v66_v23 = vrot.slane %v38_v14, %v28_v7  ;;  %v68_v24 = vcombine.high %v52_v13, %v52_v13  ;;  %p155_p3 = por %p154_p2, %p153_p1 }
   0xd   :  { %v111_v25 = vadd.f32 %v74_v16, %v12_v15  ;;  %v78_v26 = vrot.slane %v59_v17, %v73_v9  ;;  %v82_v27 = vrot.slane %v67_v18, %v73_v9  ;;  %v69_v28 = vcombine.high %v59_v17, %v59_v17 }
   0xe   :  { %v115_v32 = vadd.f32 %v90_v20, %v16_v19  ;;  %v94_v33 = vrot.slane %v66_v23, %v73_v9  ;;  %v98_v34 = vrot.slane %v68_v24, %v73_v9  ;;  %v70_v35 = vcombine.high %v66_v23, %v66_v23  ;;  %p156_p4 = pnand %p155_p3, %p149_p0 }
   0xf   :  { %120 = vst.msk [vmem:[#allocation2] sm:$0x3] %vm119_vm0, %v111_v25  ;;  %v112_v36 = vadd.f32 %v78_v26, %v13_v21  ;;  %v113_v37 = vadd.f32 %v82_v27, %v14_v22  ;;  %v86_v38 = vrot.slane %v69_v28, %v73_v9 }
  0x10   :  { %124 = vst.msk [vmem:[#allocation2 + $0x8] sm:$0x3] %vm119_vm0, %v115_v32  ;;  %v116_v40 = vadd.f32 %v94_v33, %v17_v29  ;;  %v117_v41 = vadd.f32 %v98_v34, %v18_v30  ;;  %v102_v42 = vrot.slane %v70_v35, %v73_v9 }
  0x11   :  { %121 = vst.msk [vmem:[#allocation2 + $0x2] sm:$0x3] %vm119_vm0, %v112_v36  ;;  %122 = vst.msk [vmem:[#allocation2 + $0x4] sm:$0x3] %vm119_vm0, %v113_v37  ;;  %v114_v43 = vadd.f32 %v86_v38, %v15_v31 }
  0x12   :  { %125 = vst.msk [vmem:[#allocation2 + $0xa] sm:$0x3] %vm119_vm0, %v116_v40  ;;  %126 = vst.msk [vmem:[#allocation2 + $0xc] sm:$0x3] %vm119_vm0, %v117_v41  ;;  %v118_v44 = vadd.f32 %v102_v42, %v19_v39 }
  0x13   :  { %123 = vst.msk [vmem:[#allocation2 + $0x6] sm:$0x3] %vm119_vm0, %v114_v43 }
  0x14   :  { %127 = vst.msk [vmem:[#allocation2 + $0xe] sm:$0x3] %vm119_vm0, %v118_v44 }
  0x15   :  { %159 = shalt.err (!%p156_p4)
}
  0x16   :  { %s172_s28 = smov 32   ;;  %s173_s29 = smov 2  }
  0x17   :  { %139 = dma.vmem_to_hbm [thread:$0]  %s134_s27, 256, %s229_s2, [#allocation3], %s172_s28, %s172_s28, %s173_s29  }
  0x18   :  { %168 = dma.done.wait [#allocation3], 256  }
  0x19   :  { %169 = vsyncadd [#allocation3], 4294967040 }
  0x1a   :  { %143 = vsyncpa [#allocation3], 1 }

</bundles_post_ra>
